<compile_context>
chip_gen: v6e
topology: v6e:2x2x1
jax: 0.10.0
libtpu: 0.0.40
codegen_flags: <defaults>
</compile_context>

<pallas_src>
import jax
import jax.numpy as jnp
from jax.experimental import pallas as pl
from jax.experimental.pallas import tpu as pltpu

PAD_IDX, SOS_IDX, EOS_IDX = 0, 1, 2
NEG = -10000.0       # sentinel used by the model itself (matches reference)
NEG_PAD = -1.0e9     # sentinel for padded tag rows/cols (can never leak)
RENORM = 8           # steps between alpha renormalizations (dynamic-range guard)


def _round_up(x, m):
    return ((x + m - 1) // m) * m


def _cdiv(a, b):
    return -(-a // b)


def _megacore():
    """True on chips where a 'parallel' grid dim is split across 2 TensorCores."""
    try:
        kind = jax.devices()[0].device_kind.lower()
    except Exception:
        return False
    return any(tag in kind for tag in ("v7", "v5p", "v4"))


def crf_forward_kernel(maxlen_ref, eh_ref, len_ref, base_ref, expT_ref, eos_ref,
                       out_ref, alpha_ref, scale_ref):
    # maxlen_ref: (nb,) int32 SMEM   per-batch-block max sequence length (prefetch)
    # eh_ref    : (T_BLK, K8, Bs)    exp-shifted emissions, tags on sublanes,
    #                                batch on lanes
    # len_ref   : (1, Bs) int32      per-example sequence lengths
    # base_ref  : (1, Bs) f32        cE + sum of per-step emission shifts
    # expT_ref  : (K8, K8) f32       expT[i, j] = exp(trans[i, j] - c[i])
    # eos_ref   : (K8, 1) f32        exp(trans[EOS, k] - cE)
    # out_ref   : (1, Bs) f32        final log-Z (written on last time block)
    # alpha_ref : (K8, Bs) f32       scaled forward variable (carried across blocks)
    # scale_ref : (1, Bs) f32        accumulated renormalization log-shift
    b_blk = pl.program_id(0)
    t_blk = pl.program_id(1)
    T_BLK, K8, Bs = eh_ref.shape

    # init carried (alpha, scale) at the first time block of each batch block:
    # alpha = one-hot on SOS  (exp(-10000) == 0 in f32, exactly like the reference)
    @pl.when(t_blk == 0)
    def _():
        row = jax.lax.broadcasted_iota(jnp.int32, (K8, Bs), 0)
        alpha_ref[...] = jnp.where(row == SOS_IDX, 1.0, 0.0).astype(jnp.float32)
        scale_ref[...] = jnp.zeros((1, Bs), jnp.float32)

    blk_start = t_blk * T_BLK

    # ragged early exit: skip time blocks entirely beyond this batch block's
    # longest sequence.  (Finalization below still runs on the last block.)
    @pl.when(blk_start < maxlen_ref[b_blk])
    def _():
        expT = expT_ref[...]            # (K8, K8)  loop-invariant
        len_row = len_ref[...]          # (1, Bs)   loop-invariant

        def renorm_chunk(ci, carry):
            alpha, scale = carry
            t0 = ci * RENORM

            def step(si, a):
                t = t0 + si
                live = (blk_start + t) < len_row        # (1, Bs), off the alpha chain
                a_new = eh_ref[t] * jnp.dot(
                    expT, a, preferred_element_type=jnp.float32)
                # where (not multiply) so frozen rows carry alpha unchanged.
                return jnp.where(live, a_new, a)

            alpha = jax.lax.fori_loop(0, RENORM, step, alpha, unroll=True)
            # Renormalize so alpha stays inside f32 range.  (alpha, scale) stay
            # exactly consistent because we subtract log of the factor applied,
            # so the approx reciprocal introduces no bias.
            r = jnp.max(alpha, axis=0, keepdims=True)          # (1, Bs)
            inv = pl.reciprocal(jnp.maximum(r, 1e-37), approx=True)
            return alpha * inv, scale - jnp.log(inv)

        alpha, scale = jax.lax.fori_loop(
            0, T_BLK // RENORM, renorm_chunk, (alpha_ref[...], scale_ref[...]))
        alpha_ref[...] = alpha
        scale_ref[...] = scale

    # finalize: transition into EOS (already exp-shifted by cE, which lives in
    # `base`), sum over tags, one log per batch element.
    @pl.when(t_blk == pl.num_programs(1) - 1)
    def _():
        s = jnp.sum(alpha_ref[...] * eos_ref[...], axis=0, keepdims=True)  # (1, Bs)
        out_ref[...] = scale_ref[...] + base_ref[...] + jnp.log(jnp.maximum(s, 1e-37))


def crf_forward(h, mask, trans):
    """h: (B, T, K) float, mask: (B, T) {0,1} length-prefix mask, trans: (K, K).

    Returns the CRF log-partition function, shape (B,).
    """
    B, T, K = h.shape
    h32 = h.astype(jnp.float32)
    mask32 = mask.astype(jnp.float32)
    trans32 = trans.astype(jnp.float32)

    K8 = _round_up(K, 8)

    # ---- batch blocking: batch on the 128-lane axis --------------------------
    if B > 128:
        Bs, nb = 128, _cdiv(B, 128)
    elif B >= 16 and _megacore():
        nb = 2                                   # give the second TensorCore work
        Bs = _round_up(_cdiv(B, 2), 8)
    else:
        nb, Bs = 1, _round_up(B, 8)
    Bp = nb * Bs

    # ---- time blocking: amortize grid overhead, cap eh double-buffer ~8 MiB --
    t_cap = (4 * 1024 * 1024) // (K8 * Bs * 4)
    t_cap = max(RENORM, min(128, (t_cap // RENORM) * RENORM))
    T_BLK = min(_round_up(T, RENORM), t_cap)
    Tp = _round_up(T, T_BLK)
    nt = Tp // T_BLK

    # ---- transition preprocessing (once) --------------------------------------
    trans_p = jnp.pad(trans32, ((0, K8 - K), (0, K8 - K)), constant_values=NEG_PAD)
    c = jnp.max(trans_p, axis=1, keepdims=True)             # (K8,1): c[i]=max_j trans[i,j]
    expT = jnp.exp(trans_p - c)                              # (K8,K8) in [0,1]
    cE = jnp.max(trans_p[EOS_IDX])                           # scalar
    eosexp = jnp.exp(trans_p[EOS_IDX] - cE).reshape(K8, 1)   # (K8,1), padded tags -> 0

    # ---- emission preprocessing (fused with the layout transpose below) ------
    c_real = c[:K, 0]                                        # (K,)
    hc = h32 + c_real[None, None, :]                         # (B,T,K)
    m_bt = jnp.max(hc, axis=-1)                              # (B,T) per-step shift
    ehK = jnp.exp(hc - m_bt[..., None])                      # (B,T,K) in [0,1]

    # length-prefix mask assumption (standard CRF usage, same as score()/decode()).
    lengths = jnp.sum(mask32, axis=1).astype(jnp.int32)      # (B,)
    base = cE + jnp.sum(mask32 * m_bt, axis=1)               # (B,)

    # ---- pad + reshape to kernel layout (nb, Tp, K8, Bs) ---------------------
    eh_p = jnp.pad(ehK, ((0, Bp - B), (0, Tp - T), (0, K8 - K)))
    eh_km = eh_p.reshape(nb, Bs, Tp, K8).transpose(0, 2, 3, 1)    # (nb,Tp,K8,Bs)
    len_p = jnp.pad(lengths, (0, Bp - B)).reshape(nb, 1, Bs)
    base_p = jnp.pad(base, (0, Bp - B)).reshape(nb, 1, Bs).astype(jnp.float32)
    maxlen = jnp.max(len_p, axis=2).reshape(nb).astype(jnp.int32)  # (nb,)

    out = pl.pallas_call(
        crf_forward_kernel,
        out_shape=jax.ShapeDtypeStruct((nb, 1, Bs), jnp.float32),
        grid_spec=pltpu.PrefetchScalarGridSpec(
            num_scalar_prefetch=1,
            grid=(nb, nt),
            in_specs=[
                pl.BlockSpec((None, T_BLK, K8, Bs), lambda b, t, ml: (b, t, 0, 0)),
                pl.BlockSpec((None, 1, Bs), lambda b, t, ml: (b, 0, 0)),
                pl.BlockSpec((None, 1, Bs), lambda b, t, ml: (b, 0, 0)),
                pl.BlockSpec((K8, K8), lambda b, t, ml: (0, 0)),
                pl.BlockSpec((K8, 1), lambda b, t, ml: (0, 0)),
            ],
            out_specs=pl.BlockSpec((None, 1, Bs), lambda b, t, ml: (b, 0, 0)),
            scratch_shapes=[pltpu.VMEM((K8, Bs), jnp.float32),   # alpha
                            pltpu.VMEM((1, Bs), jnp.float32)],   # scale
        ),
        compiler_params=pltpu.CompilerParams(
            dimension_semantics=("parallel", "arbitrary")),
    )(maxlen, eh_km, len_p, base_p, expT, eosexp)

    return out.reshape(Bp)[:B]


def crf_forward_ref(h, mask, trans):
    """Pure-JAX reference mirroring the PyTorch forward."""
    B, T, K = h.shape
    score = jnp.full((B, K), NEG, jnp.float32).at[:, SOS_IDX].set(0.0)
    for t in range(T):
        mask_t = mask[:, t][:, None]
        x = score[:, None, :] + h[:, t][:, :, None] + trans[None, :, :]
        m = jnp.max(x, -1)
        lse = m + jnp.log(jnp.sum(jnp.exp(x - m[..., None]), -1))
        score = lse * mask_t + score * (1.0 - mask_t)
    final = score + trans[EOS_IDX]
    m = jnp.max(final, -1)
    return m + jnp.log(jnp.sum(jnp.exp(final - m[:, None]), -1))


def init_trans(key, num_tags):
    """Deterministic parameter init matching crf.__init__ constraints."""
    trans = jax.random.normal(key, (num_tags, num_tags), jnp.float32)
    trans = trans.at[SOS_IDX, :].set(NEG)
    trans = trans.at[:, EOS_IDX].set(NEG)
    trans = trans.at[:, PAD_IDX].set(NEG)
    trans = trans.at[PAD_IDX, :].set(NEG)
    trans = trans.at[PAD_IDX, EOS_IDX].set(0.0)
    trans = trans.at[PAD_IDX, PAD_IDX].set(0.0)
    return trans


if __name__ == "__main__":
    # case 1: the module's canonical small shapes
    batch, seq, num_tags = 2, 8, 8
    key = jax.random.PRNGKey(0)
    k_trans, k_h = jax.random.split(key)
    trans = init_trans(k_trans, num_tags)
    h = jax.random.normal(k_h, (batch, seq, num_tags), jnp.float32)
    lengths = jnp.array([8, 5], jnp.int32)
    mask = (jnp.arange(seq)[None, :] < lengths[:, None]).astype(jnp.float32)

    out = jax.block_until_ready(crf_forward(h, mask, trans))
    ref = crf_forward_ref(h, mask, trans)
    assert out.shape == (batch,)
    assert jnp.allclose(out, ref, atol=1e-2, rtol=1e-4), (out, ref)

    # case 2: ragged lengths, K not a multiple of 8, T not a multiple of RENORM
    b2, t2, k2 = 5, 23, 11
    k_t2, k_h2 = jax.random.split(jax.random.PRNGKey(1))
    trans2 = init_trans(k_t2, k2)
    h2 = jax.random.normal(k_h2, (b2, t2, k2), jnp.float32)
    lens2 = jnp.array([23, 17, 9, 1, 0], jnp.int32)
    mask2 = (jnp.arange(t2)[None, :] < lens2[:, None]).astype(jnp.float32)

    out2 = jax.block_until_ready(crf_forward(h2, mask2, trans2))
    ref2 = crf_forward_ref(h2, mask2, trans2)
    assert jnp.allclose(out2, ref2, atol=1e-2, rtol=1e-4), (out2, ref2)

    print("KERNEL_OK")
</pallas_src>

<mosaic_0001>
module attributes {stable_mosaic.version = 11 : i64} {
  func.func @crf_forward_kernel(%arg0: i32, %arg1: i32, %arg2: memref<1xi32, #tpu.memory_space<smem>>, %arg3: memref<1x8x8x8xf32, #tpu.memory_space<vmem>>, %arg4: memref<1x1x8xi32, #tpu.memory_space<vmem>>, %arg5: memref<1x1x8xf32, #tpu.memory_space<vmem>>, %arg6: memref<8x8xf32, #tpu.memory_space<vmem>>, %arg7: memref<8x1xf32, #tpu.memory_space<vmem>>, %arg8: memref<1x1x8xf32, #tpu.memory_space<vmem>>, %arg9: memref<8x8xf32, #tpu.memory_space<vmem>>, %arg10: memref<1x8xf32, #tpu.memory_space<vmem>>) attributes {dimension_semantics = [#tpu.dimension_semantics<parallel>, #tpu.dimension_semantics<arbitrary>], iteration_bounds = array<i64: 1, 1>, scalar_prefetch = 1 : i64, scratch_operands = 2 : i64, tpu.core_type = #tpu.core_type<tc>, window_params = [{transform_indices = @transform_0, window_bounds = array<i64: 1, 8, 8, 8>}, {transform_indices = @transform_1, window_bounds = array<i64: 1, 1, 8>}, {transform_indices = @transform_2, window_bounds = array<i64: 1, 1, 8>}, {pipeline_mode = #tpu.pipeline_mode<synchronous>, transform_indices = @transform_3, window_bounds = array<i64: 8, 8>}, {pipeline_mode = #tpu.pipeline_mode<synchronous>, transform_indices = @transform_4, window_bounds = array<i64: 8, 1>}, {transform_indices = @transform_5, window_bounds = array<i64: 1, 1, 8>}]} {
    %c0_i32 = arith.constant 0 : i32
    %0 = arith.cmpi eq, %arg1, %c0_i32 : i32
    %1 = arith.extui %0 : i1 to i32
    %c0_i32_0 = arith.constant 0 : i32
    %2 = arith.cmpi ne, %1, %c0_i32_0 : i32
    scf.if %2 {
      %12 = tpu.iota {dimensions = array<i32: 0>} : vector<8x8xi32>
      %c1_i32 = arith.constant 1 : i32
      %13 = vector.broadcast %c1_i32 : i32 to vector<8x8xi32>
      %14 = arith.cmpi eq, %12, %13 : vector<8x8xi32>
      %cst = arith.constant 1.000000e+00 : f32
      %cst_4 = arith.constant 0.000000e+00 : f32
      %15 = vector.broadcast %cst : f32 to vector<8x8xf32>
      %16 = vector.broadcast %cst_4 : f32 to vector<8x8xf32>
      %17 = arith.select %14, %15, %16 : vector<8x8xi1>, vector<8x8xf32>
      %c0 = arith.constant 0 : index
      %c0_5 = arith.constant 0 : index
      %18 = vector.load %arg9[%c0, %c0_5] : memref<8x8xf32, #tpu.memory_space<vmem>>, vector<8x8xf32>
      tpu.vector_store %arg9[%c0, %c0_5], %17 {strides = array<i32>} : memref<8x8xf32, #tpu.memory_space<vmem>>, vector<8x8xf32>,
      %cst_6 = arith.constant 0.000000e+00 : f32
      %19 = vector.broadcast %cst_6 : f32 to vector<1x8xf32>
      %c0_7 = arith.constant 0 : index
      %c0_8 = arith.constant 0 : index
      %20 = vector.load %arg10[%c0_7, %c0_8] : memref<1x8xf32, #tpu.memory_space<vmem>>, vector<1x8xf32>
      tpu.vector_store %arg10[%c0_7, %c0_8], %19 {strides = array<i32>} : memref<1x8xf32, #tpu.memory_space<vmem>>, vector<1x8xf32>,
    } else {
    }
    %c8_i32 = arith.constant 8 : i32
    %3 = arith.muli %arg1, %c8_i32 : i32
    %4 = arith.index_cast %arg0 : i32 to index
    %5 = memref.load %arg2[%4] : memref<1xi32, #tpu.memory_space<smem>>
    %6 = arith.cmpi slt, %3, %5 : i32
    %7 = arith.extui %6 : i1 to i32
    %c0_i32_1 = arith.constant 0 : i32
    %8 = arith.cmpi ne, %7, %c0_i32_1 : i32
    scf.if %8 {
      %c0 = arith.constant 0 : index
      %c0_4 = arith.constant 0 : index
      %12 = vector.load %arg6[%c0, %c0_4] : memref<8x8xf32, #tpu.memory_space<vmem>>, vector<8x8xf32>
      %c0_5 = arith.constant 0 : index
      %c0_6 = arith.constant 0 : index
      %c0_7 = arith.constant 0 : index
      %13 = vector.load %arg4[%c0_5, %c0_6, %c0_7] : memref<1x1x8xi32, #tpu.memory_space<vmem>>, vector<1x1x8xi32>
      %14 = vector.shape_cast %13 : vector<1x1x8xi32> to vector<1x8xi32>
      %c0_8 = arith.constant 0 : index
      %c0_9 = arith.constant 0 : index
      %15 = vector.load %arg9[%c0_8, %c0_9] : memref<8x8xf32, #tpu.memory_space<vmem>>, vector<8x8xf32>
      %c0_10 = arith.constant 0 : index
      %c0_11 = arith.constant 0 : index
      %16 = vector.load %arg10[%c0_10, %c0_11] : memref<1x8xf32, #tpu.memory_space<vmem>>, vector<1x8xf32>
      %c0_i32_12 = arith.constant 0 : i32
      %c8_i32_13 = arith.constant 8 : i32
      %17 = arith.muli %c0_i32_12, %c8_i32_13 : i32
      %c0_i32_14 = arith.constant 0 : i32
      %18 = arith.addi %17, %c0_i32_14 : i32
      %19 = arith.addi %3, %18 : i32
      %20 = vector.broadcast %19 : i32 to vector<1x8xi32>
      %21 = arith.cmpi slt, %20, %14 : vector<1x8xi32>
      %c0_15 = arith.constant 0 : index
      %22 = arith.index_cast %18 : i32 to index
      %c0_16 = arith.constant 0 : index
      %c0_17 = arith.constant 0 : index
      %23 = vector.load %arg3[%c0_15, %22, %c0_16, %c0_17] : memref<1x8x8x8xf32, #tpu.memory_space<vmem>>, vector<1x1x8x8xf32>
      %24 = vector.shape_cast %23 : vector<1x1x8x8xf32> to vector<8x8xf32>
      %cst = arith.constant dense<0.000000e+00> : vector<8x8xf32>
      %25 = tpu.matmul %12, %15, %cst {dimension_numbers = #tpu.dot_dimension_numbers<[1], [0], [0], [1], [0, 0, 1, 1], [], []>} : vector<8x8xf32>, vector<8x8xf32>, vector<8x8xf32> -> vector<8x8xf32>
      %26 = arith.mulf %24, %25 : vector<8x8xf32>
      %27 = vector.shape_cast %21 : vector<1x8xi1> to vector<1x8xi1>
      %28 = vector.broadcast %27 : vector<1x8xi1> to vector<8x8xi1>
      %29 = arith.select %28, %26, %15 : vector<8x8xi1>, vector<8x8xf32>
      %c1_i32 = arith.constant 1 : i32
      %30 = arith.addi %17, %c1_i32 : i32
      %31 = arith.addi %3, %30 : i32
      %32 = vector.broadcast %31 : i32 to vector<1x8xi32>
      %33 = arith.cmpi slt, %32, %14 : vector<1x8xi32>
      %c0_18 = arith.constant 0 : index
      %34 = arith.index_cast %30 : i32 to index
      %c0_19 = arith.constant 0 : index
      %c0_20 = arith.constant 0 : index
      %35 = vector.load %arg3[%c0_18, %34, %c0_19, %c0_20] : memref<1x8x8x8xf32, #tpu.memory_space<vmem>>, vector<1x1x8x8xf32>
      %36 = vector.shape_cast %35 : vector<1x1x8x8xf32> to vector<8x8xf32>
      %cst_21 = arith.constant dense<0.000000e+00> : vector<8x8xf32>
      %37 = tpu.matmul %12, %29, %cst_21 {dimension_numbers = #tpu.dot_dimension_numbers<[1], [0], [0], [1], [0, 0, 1, 1], [], []>} : vector<8x8xf32>, vector<8x8xf32>, vector<8x8xf32> -> vector<8x8xf32>
      %38 = arith.mulf %36, %37 : vector<8x8xf32>
      %39 = vector.shape_cast %33 : vector<1x8xi1> to vector<1x8xi1>
      %40 = vector.broadcast %39 : vector<1x8xi1> to vector<8x8xi1>
      %41 = arith.select %40, %38, %29 : vector<8x8xi1>, vector<8x8xf32>
      %c2_i32 = arith.constant 2 : i32
      %42 = arith.addi %17, %c2_i32 : i32
      %43 = arith.addi %3, %42 : i32
      %44 = vector.broadcast %43 : i32 to vector<1x8xi32>
      %45 = arith.cmpi slt, %44, %14 : vector<1x8xi32>
      %c0_22 = arith.constant 0 : index
      %46 = arith.index_cast %42 : i32 to index
      %c0_23 = arith.constant 0 : index
      %c0_24 = arith.constant 0 : index
      %47 = vector.load %arg3[%c0_22, %46, %c0_23, %c0_24] : memref<1x8x8x8xf32, #tpu.memory_space<vmem>>, vector<1x1x8x8xf32>
      %48 = vector.shape_cast %47 : vector<1x1x8x8xf32> to vector<8x8xf32>
      %cst_25 = arith.constant dense<0.000000e+00> : vector<8x8xf32>
      %49 = tpu.matmul %12, %41, %cst_25 {dimension_numbers = #tpu.dot_dimension_numbers<[1], [0], [0], [1], [0, 0, 1, 1], [], []>} : vector<8x8xf32>, vector<8x8xf32>, vector<8x8xf32> -> vector<8x8xf32>
      %50 = arith.mulf %48, %49 : vector<8x8xf32>
      %51 = vector.shape_cast %45 : vector<1x8xi1> to vector<1x8xi1>
      %52 = vector.broadcast %51 : vector<1x8xi1> to vector<8x8xi1>
      %53 = arith.select %52, %50, %41 : vector<8x8xi1>, vector<8x8xf32>
      %c3_i32 = arith.constant 3 : i32
      %54 = arith.addi %17, %c3_i32 : i32
      %55 = arith.addi %3, %54 : i32
      %56 = vector.broadcast %55 : i32 to vector<1x8xi32>
      %57 = arith.cmpi slt, %56, %14 : vector<1x8xi32>
      %c0_26 = arith.constant 0 : index
      %58 = arith.index_cast %54 : i32 to index
      %c0_27 = arith.constant 0 : index
      %c0_28 = arith.constant 0 : index
      %59 = vector.load %arg3[%c0_26, %58, %c0_27, %c0_28] : memref<1x8x8x8xf32, #tpu.memory_space<vmem>>, vector<1x1x8x8xf32>
      %60 = vector.shape_cast %59 : vector<1x1x8x8xf32> to vector<8x8xf32>
      %cst_29 = arith.constant dense<0.000000e+00> : vector<8x8xf32>
      %61 = tpu.matmul %12, %53, %cst_29 {dimension_numbers = #tpu.dot_dimension_numbers<[1], [0], [0], [1], [0, 0, 1, 1], [], []>} : vector<8x8xf32>, vector<8x8xf32>, vector<8x8xf32> -> vector<8x8xf32>
      %62 = arith.mulf %60, %61 : vector<8x8xf32>
      %63 = vector.shape_cast %57 : vector<1x8xi1> to vector<1x8xi1>
      %64 = vector.broadcast %63 : vector<1x8xi1> to vector<8x8xi1>
      %65 = arith.select %64, %62, %53 : vector<8x8xi1>, vector<8x8xf32>
      %c4_i32 = arith.constant 4 : i32
      %66 = arith.addi %17, %c4_i32 : i32
      %67 = arith.addi %3, %66 : i32
      %68 = vector.broadcast %67 : i32 to vector<1x8xi32>
      %69 = arith.cmpi slt, %68, %14 : vector<1x8xi32>
      %c0_30 = arith.constant 0 : index
      %70 = arith.index_cast %66 : i32 to index
      %c0_31 = arith.constant 0 : index
      %c0_32 = arith.constant 0 : index
      %71 = vector.load %arg3[%c0_30, %70, %c0_31, %c0_32] : memref<1x8x8x8xf32, #tpu.memory_space<vmem>>, vector<1x1x8x8xf32>
      %72 = vector.shape_cast %71 : vector<1x1x8x8xf32> to vector<8x8xf32>
      %cst_33 = arith.constant dense<0.000000e+00> : vector<8x8xf32>
      %73 = tpu.matmul %12, %65, %cst_33 {dimension_numbers = #tpu.dot_dimension_numbers<[1], [0], [0], [1], [0, 0, 1, 1], [], []>} : vector<8x8xf32>, vector<8x8xf32>, vector<8x8xf32> -> vector<8x8xf32>
      %74 = arith.mulf %72, %73 : vector<8x8xf32>
      %75 = vector.shape_cast %69 : vector<1x8xi1> to vector<1x8xi1>
      %76 = vector.broadcast %75 : vector<1x8xi1> to vector<8x8xi1>
      %77 = arith.select %76, %74, %65 : vector<8x8xi1>, vector<8x8xf32>
      %c5_i32 = arith.constant 5 : i32
      %78 = arith.addi %17, %c5_i32 : i32
      %79 = arith.addi %3, %78 : i32
      %80 = vector.broadcast %79 : i32 to vector<1x8xi32>
      %81 = arith.cmpi slt, %80, %14 : vector<1x8xi32>
      %c0_34 = arith.constant 0 : index
      %82 = arith.index_cast %78 : i32 to index
      %c0_35 = arith.constant 0 : index
      %c0_36 = arith.constant 0 : index
      %83 = vector.load %arg3[%c0_34, %82, %c0_35, %c0_36] : memref<1x8x8x8xf32, #tpu.memory_space<vmem>>, vector<1x1x8x8xf32>
      %84 = vector.shape_cast %83 : vector<1x1x8x8xf32> to vector<8x8xf32>
      %cst_37 = arith.constant dense<0.000000e+00> : vector<8x8xf32>
      %85 = tpu.matmul %12, %77, %cst_37 {dimension_numbers = #tpu.dot_dimension_numbers<[1], [0], [0], [1], [0, 0, 1, 1], [], []>} : vector<8x8xf32>, vector<8x8xf32>, vector<8x8xf32> -> vector<8x8xf32>
      %86 = arith.mulf %84, %85 : vector<8x8xf32>
      %87 = vector.shape_cast %81 : vector<1x8xi1> to vector<1x8xi1>
      %88 = vector.broadcast %87 : vector<1x8xi1> to vector<8x8xi1>
      %89 = arith.select %88, %86, %77 : vector<8x8xi1>, vector<8x8xf32>
      %c6_i32 = arith.constant 6 : i32
      %90 = arith.addi %17, %c6_i32 : i32
      %91 = arith.addi %3, %90 : i32
      %92 = vector.broadcast %91 : i32 to vector<1x8xi32>
      %93 = arith.cmpi slt, %92, %14 : vector<1x8xi32>
      %c0_38 = arith.constant 0 : index
      %94 = arith.index_cast %90 : i32 to index
      %c0_39 = arith.constant 0 : index
      %c0_40 = arith.constant 0 : index
      %95 = vector.load %arg3[%c0_38, %94, %c0_39, %c0_40] : memref<1x8x8x8xf32, #tpu.memory_space<vmem>>, vector<1x1x8x8xf32>
      %96 = vector.shape_cast %95 : vector<1x1x8x8xf32> to vector<8x8xf32>
      %cst_41 = arith.constant dense<0.000000e+00> : vector<8x8xf32>
      %97 = tpu.matmul %12, %89, %cst_41 {dimension_numbers = #tpu.dot_dimension_numbers<[1], [0], [0], [1], [0, 0, 1, 1], [], []>} : vector<8x8xf32>, vector<8x8xf32>, vector<8x8xf32> -> vector<8x8xf32>
      %98 = arith.mulf %96, %97 : vector<8x8xf32>
      %99 = vector.shape_cast %93 : vector<1x8xi1> to vector<1x8xi1>
      %100 = vector.broadcast %99 : vector<1x8xi1> to vector<8x8xi1>
      %101 = arith.select %100, %98, %89 : vector<8x8xi1>, vector<8x8xf32>
      %c7_i32 = arith.constant 7 : i32
      %102 = arith.addi %17, %c7_i32 : i32
      %103 = arith.addi %3, %102 : i32
      %104 = vector.broadcast %103 : i32 to vector<1x8xi32>
      %105 = arith.cmpi slt, %104, %14 : vector<1x8xi32>
      %c0_42 = arith.constant 0 : index
      %106 = arith.index_cast %102 : i32 to index
      %c0_43 = arith.constant 0 : index
      %c0_44 = arith.constant 0 : index
      %107 = vector.load %arg3[%c0_42, %106, %c0_43, %c0_44] : memref<1x8x8x8xf32, #tpu.memory_space<vmem>>, vector<1x1x8x8xf32>
      %108 = vector.shape_cast %107 : vector<1x1x8x8xf32> to vector<8x8xf32>
      %cst_45 = arith.constant dense<0.000000e+00> : vector<8x8xf32>
      %109 = tpu.matmul %12, %101, %cst_45 {dimension_numbers = #tpu.dot_dimension_numbers<[1], [0], [0], [1], [0, 0, 1, 1], [], []>} : vector<8x8xf32>, vector<8x8xf32>, vector<8x8xf32> -> vector<8x8xf32>
      %110 = arith.mulf %108, %109 : vector<8x8xf32>
      %111 = vector.shape_cast %105 : vector<1x8xi1> to vector<1x8xi1>
      %112 = vector.broadcast %111 : vector<1x8xi1> to vector<8x8xi1>
      %113 = arith.select %112, %110, %101 : vector<8x8xi1>, vector<8x8xf32>
      %c8_i32_46 = arith.constant 8 : i32
      %cst_47 = arith.constant dense<0xFF800000> : vector<8xf32>
      %114 = vector.multi_reduction <maximumf>, %113, %cst_47 [0] : vector<8x8xf32> to vector<8xf32>
      %115 = vector.shape_cast %114 : vector<8xf32> to vector<1x8xf32>
      %cst_48 = arith.constant 9.99999991E-38 : f32
      %116 = vector.broadcast %cst_48 : f32 to vector<1x8xf32>
      %117 = arith.maximumf %115, %116 : vector<1x8xf32>
      %118 = tpu.reciprocal %117 {approx = true} : vector<1x8xf32> -> vector<1x8xf32>
      %119 = vector.broadcast %118 : vector<1x8xf32> to vector<8x8xf32>
      %120 = arith.mulf %113, %119 : vector<8x8xf32>
      %121 = math.log %118 : vector<1x8xf32>
      %122 = arith.subf %16, %121 : vector<1x8xf32>
      %c1_i32_49 = arith.constant 1 : i32
      %c0_50 = arith.constant 0 : index
      %c0_51 = arith.constant 0 : index
      %123 = vector.load %arg9[%c0_50, %c0_51] : memref<8x8xf32, #tpu.memory_space<vmem>>, vector<8x8xf32>
      tpu.vector_store %arg9[%c0_50, %c0_51], %120 {strides = array<i32>} : memref<8x8xf32, #tpu.memory_space<vmem>>, vector<8x8xf32>,
      %c0_52 = arith.constant 0 : index
      %c0_53 = arith.constant 0 : index
      %124 = vector.load %arg10[%c0_52, %c0_53] : memref<1x8xf32, #tpu.memory_space<vmem>>, vector<1x8xf32>
      tpu.vector_store %arg10[%c0_52, %c0_53], %122 {strides = array<i32>} : memref<1x8xf32, #tpu.memory_space<vmem>>, vector<1x8xf32>,
    } else {
    }
    %c0_i32_2 = arith.constant 0 : i32
    %9 = arith.cmpi eq, %arg1, %c0_i32_2 : i32
    %10 = arith.extui %9 : i1 to i32
    %c0_i32_3 = arith.constant 0 : i32
    %11 = arith.cmpi ne, %10, %c0_i32_3 : i32
    scf.if %11 {
      %c0 = arith.constant 0 : index
      %c0_4 = arith.constant 0 : index
      %12 = vector.load %arg9[%c0, %c0_4] : memref<8x8xf32, #tpu.memory_space<vmem>>, vector<8x8xf32>
      %c0_5 = arith.constant 0 : index
      %c0_6 = arith.constant 0 : index
      %13 = vector.load %arg7[%c0_5, %c0_6] : memref<8x1xf32, #tpu.memory_space<vmem>>, vector<8x1xf32>
      %14 = vector.broadcast %13 : vector<8x1xf32> to vector<8x8xf32>
      %15 = arith.mulf %12, %14 : vector<8x8xf32>
      %cst = arith.constant dense<0.000000e+00> : vector<8xf32>
      %16 = vector.multi_reduction <add>, %15, %cst [0] : vector<8x8xf32> to vector<8xf32>
      %17 = vector.shape_cast %16 : vector<8xf32> to vector<1x8xf32>
      %c0_7 = arith.constant 0 : index
      %c0_8 = arith.constant 0 : index
      %18 = vector.load %arg10[%c0_7, %c0_8] : memref<1x8xf32, #tpu.memory_space<vmem>>, vector<1x8xf32>
      %c0_9 = arith.constant 0 : index
      %c0_10 = arith.constant 0 : index
      %c0_11 = arith.constant 0 : index
      %19 = vector.load %arg5[%c0_9, %c0_10, %c0_11] : memref<1x1x8xf32, #tpu.memory_space<vmem>>, vector<1x1x8xf32>
      %20 = vector.shape_cast %19 : vector<1x1x8xf32> to vector<1x8xf32>
      %21 = arith.addf %18, %20 : vector<1x8xf32>
      %cst_12 = arith.constant 9.99999991E-38 : f32
      %22 = vector.broadcast %cst_12 : f32 to vector<1x8xf32>
      %23 = arith.maximumf %17, %22 : vector<1x8xf32>
      %24 = math.log %23 : vector<1x8xf32>
      %25 = arith.addf %21, %24 : vector<1x8xf32>
      %c0_13 = arith.constant 0 : index
      %c0_14 = arith.constant 0 : index
      %c0_15 = arith.constant 0 : index
      %26 = vector.load %arg8[%c0_13, %c0_14, %c0_15] : memref<1x1x8xf32, #tpu.memory_space<vmem>>, vector<1x1x8xf32>
      %27 = vector.shape_cast %26 : vector<1x1x8xf32> to vector<1x8xf32>
      %28 = vector.shape_cast %25 : vector<1x8xf32> to vector<1x1x8xf32>
      tpu.vector_store %arg8[%c0_13, %c0_14, %c0_15], %28 {strides = array<i32>} : memref<1x1x8xf32, #tpu.memory_space<vmem>>, vector<1x1x8xf32>,
    } else {
    }
    return
  }
  func.func @transform_0(%arg0: i32, %arg1: i32, %arg2: memref<1xi32, #tpu.memory_space<smem>>) -> (i32, i32, i32, i32) {
    %c0_i32 = arith.constant 0 : i32
    %c0_i32_0 = arith.constant 0 : i32
    %c0_i32_1 = arith.constant 0 : i32
    return %arg0, %arg1, %c0_i32, %c0_i32_0 : i32, i32, i32, i32
  }
  func.func @transform_1(%arg0: i32, %arg1: i32, %arg2: memref<1xi32, #tpu.memory_space<smem>>) -> (i32, i32, i32) {
    %c0_i32 = arith.constant 0 : i32
    %c0_i32_0 = arith.constant 0 : i32
    %c0_i32_1 = arith.constant 0 : i32
    return %arg0, %c0_i32, %c0_i32_0 : i32, i32, i32
  }
  func.func @transform_2(%arg0: i32, %arg1: i32, %arg2: memref<1xi32, #tpu.memory_space<smem>>) -> (i32, i32, i32) {
    %c0_i32 = arith.constant 0 : i32
    %c0_i32_0 = arith.constant 0 : i32
    %c0_i32_1 = arith.constant 0 : i32
    return %arg0, %c0_i32, %c0_i32_0 : i32, i32, i32
  }
  func.func @transform_3(%arg0: i32, %arg1: i32, %arg2: memref<1xi32, #tpu.memory_space<smem>>) -> (i32, i32) {
    %c0_i32 = arith.constant 0 : i32
    %c0_i32_0 = arith.constant 0 : i32
    %c0_i32_1 = arith.constant 0 : i32
    return %c0_i32, %c0_i32_0 : i32, i32
  }
  func.func @transform_4(%arg0: i32, %arg1: i32, %arg2: memref<1xi32, #tpu.memory_space<smem>>) -> (i32, i32) {
    %c0_i32 = arith.constant 0 : i32
    %c0_i32_0 = arith.constant 0 : i32
    %c0_i32_1 = arith.constant 0 : i32
    return %c0_i32, %c0_i32_0 : i32, i32
  }
  func.func @transform_5(%arg0: i32, %arg1: i32, %arg2: memref<1xi32, #tpu.memory_space<smem>>) -> (i32, i32, i32) {
    %c0_i32 = arith.constant 0 : i32
    %c0_i32_0 = arith.constant 0 : i32
    %c0_i32_1 = arith.constant 0 : i32
    return %arg0, %c0_i32, %c0_i32_0 : i32, i32, i32
  }
}

</mosaic_0001>

<bundles_post_ra>
// kernel: tpu_custom_call.1
= control target key start
LH: loop header
LB: loop body
LE: loop exit
PB: predicated region body
PF: predicated region fallthrough
CT: control target
= control target key end

     0   :  { %12 = vsyncpa [#allocation7], 0  ;;  %s1060_s0 = inlined_call_operand.<no memory space> [shape: s32[1], index: 0, kind: input, shape index: {}]   ;;  %s1061_s1 = inlined_call_operand.hbm [shape: f32[1,8,8,8], index: 1, kind: input, shape index: {}]   ;;  %s1062_s2 = inlined_call_operand.vmem [shape: s32[1,1,8], index: 2, kind: input, shape index: {}]   ;;  %s1063_s3 = inlined_call_operand.vmem [shape: f32[1,1,8], index: 3, kind: input, shape index: {}]   ;;  %s1064_s4 = inlined_call_operand.vmem [shape: f32[8,8], index: 4, kind: input, shape index: {}]   ;;  %s1065_s5 = inlined_call_operand.vmem [shape: f32[8,1], index: 5, kind: input, shape index: {}]   ;;  %s1066_s6 = inlined_call_operand.hbm [shape: f32[1,1,8], index: 6, kind: output, shape index: {}]  }
   0x1   :  { %13 = vsyncpa [#allocation8], 0  ;;  %s918_s21 = smov [#allocation6]  }
   0x2   :  { %s19_s22 = sshll.u32 %s918_s21, 4  ;;  %s20_s22 = int_to_ptr.vmem [resolvable:$true] %s19_s22 }
   0x3   :  { %s882_s23 = scalar_lea.vmem %s20_s22, 1024  ;;  %p887_p1 = scmp.lt.s32.totalorder %s20_s22, %s20_s22 }
   0x4   :  { %p883_p0 = scmp.ne.s32.totalorder %s20_s22, %s882_s23  ;;  %p888_p2 = scmp.lt.s32.totalorder %s882_s23, %s882_s23 }
   0x6   :  { %p889_p3 = por %p888_p2, %p887_p1 }
   0x8   :  { %p890_p4 = pnand %p889_p3, %p883_p0 }
   0xa   :  { %893 = shalt.err (!%p890_p4)
}
   0xb   :  { %s919_s24 = smov 128   ;;  %s920_s25 = smov 8  }
   0xc   :  { %25 = dma.hbm_to_vmem [thread:$0]  %s1061_s1, 1024, %s20_s22, [#allocation7], %s919_s24, %s919_s24, %s920_s25  }
   0xd   :  { %914 = dma.done.wait [#allocation7], 1024  }
   0xe   :  { %915 = vsyncadd [#allocation7], 4294966272  ;;  %v41_v0 = vlaneseq  ;;  %vm47_vm0 = vcmask 57344   ;;  %v921_v1 = vmov 0.0   ;;  %vm45_vm1 = vcmask 64512   ;;  %p785_p5 = scmp.le.s32.totalorder %s1060_s0, 0 }
   0xf   :  { %48 = vst.msk [vmem:[#allocation3] sm:$0x1] %vm47_vm0, %v921_v1 }
  0x10   :  { %v42_v2 = vshrl.u32 %v41_v0, 7  ;;  %54 = sbr.rel (%p785_p5) target bundleno = 1652 (0x674), region = 33 }
  0x12   :  { %vm43_vm2 = vcmp.eq.s32.totalorder %v42_v2, 1 }
  0x13   :  { %v44_v3 = vsel %vm43_vm2, 1.0, %v921_v1 }
  0x14   :  { %46 = vst.msk [vmem:[#allocation2] sm:$0xff] %vm45_vm1, %v44_v3 }
  0x15   :  { %v973_v5 = vld [vmem:[%s1064_s4] sm:$0xff]  ;;  %v922_v6 = vmov 0.0   ;;  %vm923_vm3 = vmmov 0   ;;  %v992_v8 = vsub.s32 0, %v42_v2  ;;  %v924_v9 = vmov 0   ;;  %v61_v12 = vld [vmem:[#allocation6] sm:$0xff] }
  0x16   :  { %818 = vmatprep.subr.mxu0 %v922_v6  ;;  %820 = vmatprep.mubr.msk.f32.mxu0 %vm923_vm3, %v922_v6  ;;  %v989_v7 = vld [vmem:[%s1062_s2] sm:$0x1]  ;;  %v148_v19 = vld [vmem:[#allocation6 + $0x8] sm:$0xff]  ;;  %v314_v33 = vld [vmem:[#allocation6 + $0x18] sm:$0xff] }
  0x17   :  { %823 = vmatprep.subr.mxu1 %v922_v6  ;;  %825 = vmatprep.mubr.msk.f32.mxu1 %vm923_vm3, %v922_v6  ;;  %vm786_vm4 = vcmp.gt.s32.totalorder %v989_v7, 0  ;;  %vm788_vm6 = vcmp.gt.s32.totalorder %v989_v7, 1  ;;  %vm790_vm8 = vcmp.gt.s32.totalorder %v989_v7, 2  ;;  %v231_v26 = vld [vmem:[#allocation6 + $0x10] sm:$0xff]  ;;  %vm792_vm10 = vcmp.gt.s32.totalorder %v989_v7, 3  ;;  %v397_v40 = vld [vmem:[#allocation6 + $0x20] sm:$0xff] }
  0x18   :  { %v137_v10 = vsel %vm786_vm4, 1, %v924_v9  ;;  %v220_v17 = vsel %vm788_vm6, 1, %v924_v9  ;;  %v303_v24 = vsel %vm790_vm8, 1, %v924_v9  ;;  %v386_v31 = vsel %vm792_vm10, 1, %v924_v9  ;;  %v480_v47 = vld [vmem:[#allocation6 + $0x28] sm:$0xff]  ;;  %v563_v54 = vld [vmem:[#allocation6 + $0x30] sm:$0xff] }
  0x19   :  { %v141_v11 = vrot.slane %v137_v10, %v992_v8  ;;  %v224_v18 = vrot.slane %v220_v17, %v992_v8  ;;  %v307_v25 = vrot.slane %v303_v24, %v992_v8  ;;  %v390_v32 = vrot.slane %v386_v31, %v992_v8  ;;  %v646_v61 = vld [vmem:[#allocation6 + $0x38] sm:$0xff] }
  0x1a   :  { %vm794_vm12 = vcmp.gt.s32.totalorder %v989_v7, 4  ;;  %vm796_vm14 = vcmp.gt.s32.totalorder %v989_v7, 5  ;;  %vm798_vm2 = vcmp.gt.s32.totalorder %v989_v7, 6  ;;  %vm800_vm4 = vcmp.gt.s32.totalorder %v989_v7, 7 }
  0x1b   :  { %v57_v4 = vld [vmem:[#allocation2] sm:$0xff]  ;;  %vm142_vm5 = vcmp.eq.s32.totalorder %v141_v11, 1  ;;  %vm225_vm7 = vcmp.eq.s32.totalorder %v224_v18, 1  ;;  %vm308_vm9 = vcmp.eq.s32.totalorder %v307_v25, 1  ;;  %vm391_vm11 = vcmp.eq.s32.totalorder %v390_v32, 1 }
  0x1c   :  { %819 = vmatpush3.msra.mxu0 %v57_v4  ;;  %v469_v38 = vsel %vm794_vm12, 1, %v924_v9  ;;  %v552_v45 = vsel %vm796_vm14, 1, %v924_v9  ;;  %v635_v52 = vsel %vm798_vm2, 1, %v924_v9  ;;  %v718_v59 = vsel %vm800_vm4, 1, %v924_v9 }
  0x1d   :  { %821 = vmatmul.mubr.msk.f32.vlgmr.msra.gmra.mxu0 %vm45_vm1, %v973_v5  ;;  %828 = vmatprep.subr.mxu0 %v922_v6  ;;  %v473_v39 = vrot.slane %v469_v38, %v992_v8  ;;  %v556_v46 = vrot.slane %v552_v45, %v992_v8  ;;  %v639_v53 = vrot.slane %v635_v52, %v992_v8 }
  0x1e   :  { %830 = vmatprep.mubr.msk.f32.mxu0 %vm923_vm3, %v922_v6  ;;  %v722_v60 = vrot.slane %v718_v59, %v992_v8 }
  0x1f   :  { %vm474_vm13 = vcmp.eq.s32.totalorder %v473_v39, 1  ;;  %vm557_vm15 = vcmp.eq.s32.totalorder %v556_v46, 1 }
  0xdd   :  { %v132_v13 = vpop.f32.mrf.mxu0 }
  0xde   :  { %v136_v14 = vmul.f32 %v132_v13, %v61_v12  ;;  %v58_v13 = vld [vmem:[#allocation3] sm:$0x1] }
  0xdf   :  { %v822_v15 = vpop.f32.mrf.mxu0 }
  0xe0   :  { %v143_v16 = vsel %vm142_vm5, %v136_v14, %v57_v4  ;;  %vm723_vm5 = vcmp.eq.s32.totalorder %v722_v60, 1 }
  0xe1   :  { %824 = vmatpush3.msra.mxu1 %v143_v16 }
  0xe2   :  { %826 = vmatmul.mubr.msk.f32.vlgmr.msra.gmra.mxu1 %vm45_vm1, %v973_v5  ;;  %833 = vmatprep.subr.mxu1 %v922_v6 }
  0xe3   :  { %835 = vmatprep.mubr.msk.f32.mxu1 %vm923_vm3, %v922_v6 }
 0x1a2   :  { %v215_v20 = vpop.f32.mrf.mxu1 }
 0x1a3   :  { %v219_v21 = vmul.f32 %v215_v20, %v148_v19 }
 0x1a4   :  { %v827_v22 = vpop.f32.mrf.mxu1 }
 0x1a5   :  { %v226_v23 = vsel %vm225_vm7, %v219_v21, %v143_v16 }
 0x1a6   :  { %829 = vmatpush3.msra.mxu0 %v226_v23 }
 0x1a7   :  { %831 = vmatmul.mubr.msk.f32.vlgmr.msra.gmra.mxu0 %vm45_vm1, %v973_v5  ;;  %838 = vmatprep.subr.mxu0 %v922_v6 }
 0x1a8   :  { %840 = vmatprep.mubr.msk.f32.mxu0 %vm923_vm3, %v922_v6 }
 0x267   :  { %v298_v27 = vpop.f32.mrf.mxu0 }
 0x268   :  { %v302_v28 = vmul.f32 %v298_v27, %v231_v26 }
 0x269   :  { %v832_v29 = vpop.f32.mrf.mxu0 }
 0x26a   :  { %v309_v30 = vsel %vm308_vm9, %v302_v28, %v226_v23 }
 0x26b   :  { %834 = vmatpush3.msra.mxu1 %v309_v30 }
 0x26c   :  { %836 = vmatmul.mubr.msk.f32.vlgmr.msra.gmra.mxu1 %vm45_vm1, %v973_v5  ;;  %843 = vmatprep.subr.mxu1 %v922_v6 }
 0x26d   :  { %845 = vmatprep.mubr.msk.f32.mxu1 %vm923_vm3, %v922_v6 }
 0x32c   :  { %v381_v34 = vpop.f32.mrf.mxu1 }
 0x32d   :  { %v385_v35 = vmul.f32 %v381_v34, %v314_v33 }
 0x32e   :  { %v837_v36 = vpop.f32.mrf.mxu1 }
 0x32f   :  { %v392_v37 = vsel %vm391_vm11, %v385_v35, %v309_v30 }
 0x330   :  { %839 = vmatpush3.msra.mxu0 %v392_v37 }
 0x331   :  { %841 = vmatmul.mubr.msk.f32.vlgmr.msra.gmra.mxu0 %vm45_vm1, %v973_v5  ;;  %848 = vmatprep.subr.mxu0 %v922_v6 }
 0x332   :  { %850 = vmatprep.mubr.msk.f32.mxu0 %vm923_vm3, %v922_v6 }
 0x3f1   :  { %v464_v41 = vpop.f32.mrf.mxu0 }
 0x3f2   :  { %v468_v42 = vmul.f32 %v464_v41, %v397_v40 }
 0x3f3   :  { %v842_v43 = vpop.f32.mrf.mxu0 }
 0x3f4   :  { %v475_v44 = vsel %vm474_vm13, %v468_v42, %v392_v37 }
 0x3f5   :  { %844 = vmatpush3.msra.mxu1 %v475_v44 }
 0x3f6   :  { %846 = vmatmul.mubr.msk.f32.vlgmr.msra.gmra.mxu1 %vm45_vm1, %v973_v5  ;;  %853 = vmatprep.subr.mxu1 %v922_v6 }
 0x3f7   :  { %855 = vmatprep.mubr.msk.f32.mxu1 %vm923_vm3, %v922_v6  ;;  %vm640_vm3 = vcmp.eq.s32.totalorder %v639_v53, 1 }
 0x4b6   :  { %v547_v48 = vpop.f32.mrf.mxu1 }
 0x4b7   :  { %v551_v49 = vmul.f32 %v547_v48, %v480_v47 }
 0x4b8   :  { %v847_v50 = vpop.f32.mrf.mxu1 }
 0x4b9   :  { %v558_v51 = vsel %vm557_vm15, %v551_v49, %v475_v44 }
 0x4ba   :  { %849 = vmatpush3.msra.mxu0 %v558_v51 }
 0x4bb   :  { %851 = vmatmul.mubr.msk.f32.vlgmr.msra.gmra.mxu0 %vm45_vm1, %v973_v5 }
 0x57b   :  { %v630_v55 = vpop.f32.mrf.mxu0 }
 0x57c   :  { %v634_v56 = vmul.f32 %v630_v55, %v563_v54 }
 0x57d   :  { %v852_v57 = vpop.f32.mrf.mxu0 }
 0x57e   :  { %v641_v58 = vsel %vm640_vm3, %v634_v56, %v558_v51 }
 0x57f   :  { %854 = vmatpush3.msra.mxu1 %v641_v58 }
 0x580   :  { %856 = vmatmul.mubr.msk.f32.vlgmr.msra.gmra.mxu1 %vm45_vm1, %v973_v5 }
 0x640   :  { %v713_v62 = vpop.f32.mrf.mxu1 }
 0x641   :  { %v717_v63 = vmul.f32 %v713_v62, %v646_v61 }
 0x642   :  { %v857_v0 = vpop.f32.mrf.mxu1 }
 0x643   :  { %v724_v1 = vsel %vm723_vm5, %v717_v63, %v641_v58 }
 0x644   :  { %v725_v2 = vsel %vm45_vm1, %v724_v1, -inf }
 0x645   :  { %v726_v3 = vrot.slane %v725_v2, 4 }
 0x647   :  { %v727_v4 = vmax.f32 %v725_v2, %v726_v3 }
 0x649   :  { %v728_v6 = vrot.slane %v727_v4, 2 }
 0x64b   :  { %v729_v10 = vmax.f32 %v727_v4, %v728_v6 }
 0x64d   :  { %v730_v11 = vrot.slane %v729_v10, 1 }
 0x64f   :  { %v731_v5 = vmax.f32 %v729_v10, %v730_v11 }
 0x651   :  { %v732_v12 = vmax.f32 %v731_v5, 1e-37 }
 0x653   :  { %867 = vrcp.f32 %v732_v12 }
 0x660   :  { %v868_v7 = vpop.eup %867 }
 0x661   :  { %v734_v9 = vmul.f32 %v868_v7, %v724_v1  ;;  %869 = vlog2.f32 %v868_v7 }
 0x663   :  { %738 = vst.msk [vmem:[#allocation2] sm:$0xff] %vm45_vm1, %v734_v9 }
 0x66e   :  { %v870_v8 = vpop.eup %869 }
 0x66f   :  { %v736_v14 = vmul.f32 0.6931472, %v870_v8 }
 0x671   :  { %v737_v15 = vsub.f32 %v58_v13, %v736_v14 }
 0x673   :  { %740 = vst.msk [vmem:[#allocation3] sm:$0x1] %vm47_vm0, %v737_v15 }
 0x674 PF:  { %v745_v16 = vld [vmem:[%s1065_s5] sm:$0xff]  ;;  %v925_v17 = vmov 0   ;;  %s926_s5 = smov [#allocation9]  }
 0x675   :  { %871 = vset.pattern.permute.xlu0 %v925_v17  ;;  %v761_v30 = vld [vmem:[%s1063_s3] sm:$0x1]  ;;  %s775_s10 = sshll.u32 %s926_s5, 4  ;;  %s776_s10 = int_to_ptr.vmem [resolvable:$true] %s775_s10 }
 0x676   :  { %748 = vperm.xlu0 %871, %v745_v16   ;;  %s894_s11 = scalar_lea.vmem %s776_s10, 16  ;;  %s898_s12 = scalar_lea.vmem %s776_s10, 32 }
 0x677   :  { %p895_p6 = scmp.ne.s32.totalorder %s776_s10, %s894_s11  ;;  %p899_p7 = scmp.lt.s32.totalorder %s776_s10, %s776_s10 }
 0x678   :  { %p900_p8 = scmp.lt.s32.totalorder %s898_s12, %s894_s11 }
 0x67a   :  { %v744_v18 = vld [vmem:[#allocation2] sm:$0xff]  ;;  %v760_v29 = vld [vmem:[#allocation3] sm:$0x1]  ;;  %p901_p9 = por %p900_p8, %p899_p7 }
 0x67b   :  { %v762_v31 = vadd.f32 %v761_v30, %v760_v29 }
 0x67c   :  { %p902_p10 = pnand %p901_p9, %p895_p6 }
 0x6f1   :  { %v749_v19 = vpop.permute.xlu0 %748 }
 0x6f2   :  { %v751_v20 = vmul.f32 %v749_v19, %v744_v18 }
 0x6f4   :  { %v753_v21 = vsel %vm45_vm1, %v751_v20, 0.0 }
 0x6f5   :  { %v754_v22 = vrot.slane %v753_v21, 4 }
 0x6f7   :  { %v755_v23 = vadd.f32 %v754_v22, %v753_v21 }
 0x6f9   :  { %v756_v24 = vrot.slane %v755_v23, 2 }
 0x6fb   :  { %v757_v25 = vadd.f32 %v756_v24, %v755_v23 }
 0x6fd   :  { %v758_v26 = vrot.slane %v757_v25, 1 }
 0x6ff   :  { %v759_v27 = vadd.f32 %v758_v26, %v757_v25 }
 0x701   :  { %v763_v28 = vmax.f32 %v759_v27, 1e-37 }
 0x703   :  { %872 = vlog2.f32 %v763_v28 }
 0x710   :  { %v873_v32 = vpop.eup %872 }
 0x711   :  { %v765_v33 = vmul.f32 0.6931472, %v873_v32 }
 0x713   :  { %v766_v34 = vadd.f32 %v765_v33, %v762_v31 }
 0x715   :  { %768 = vst.msk [vmem:[#allocation9] sm:$0x1] %vm47_vm0, %v766_v34 }
 0x716   :  { %905 = shalt.err (!%p902_p10)
}
 0x717   :  { %778 = dma.vmem_to_hbm [thread:$0]  %s776_s10, 16, %s1066_s6, [#allocation8]  }
 0x718   :  { %916 = dma.done.wait [#allocation8], 16  }
 0x719   :  { %917 = vsyncadd [#allocation8], 4294967280 }
 0x71a   :  { %782 = vsyncpa [#allocation7], 1 }
 0x71b   :  { %783 = vsyncpa [#allocation8], 1 }

</bundles_post_ra>
